<compile_context>
chip_gen: v6e
topology: v6e:2x2x1
jax: 0.10.0
libtpu: 0.0.40
codegen_flags: <defaults>
</compile_context>

<pallas_src>
import jax
import jax.numpy as jnp
from jax.experimental import pallas as pl
from jax.experimental.pallas import tpu as pltpu


def _encoder_block_kernel(adj_ref, x_ref, w1_ref, w4_ref,
                          pw1_ref, pb1_ref, pw2_ref, pb2_ref,
                          x2_ref, out_ref):
    """One grid step processes a block of BB graphs as one block-diag matmul.

    adj_ref: (R, R)   bf16  block-diagonal adjacency for BB graphs (R = BB*N)
    x_ref:   (R, F)   bf16  node features of the BB graphs, stacked
    w1_ref:  (F, H)   bf16
    w4_ref:  (H, O)   bf16
    pw1_ref: (O, O)   bf16   proj_head weights / biases
    pb1_ref: (1, O)   f32
    pw2_ref: (O, O)   bf16
    pb2_ref: (1, O)   f32
    x2_ref:  (R, O)   f32   node embeddings (gc4 output)
    out_ref: (BB, O)  f32   proj_head(max over nodes)
    """
    R, F = x_ref.shape
    H = w1_ref.shape[1]
    O = w4_ref.shape[1]
    BB = out_ref.shape[0]
    N = R // BB
    bf16 = jnp.bfloat16
    f32 = jnp.float32

    adj = adj_ref[...]          # (R, R) bf16 block-diagonal
    x = x_ref[...]              # (R, F) bf16

    # ---- gc1: LeakyReLU(0.5)((adj @ x) @ W1) -------------------------------
    if F > H:
        # Reassociate to adj @ (x @ W1): cheaper when feat_size > hiddendim.
        xw = jnp.dot(x, w1_ref[...], preferred_element_type=f32)
        h = jnp.dot(adj, xw.astype(bf16), preferred_element_type=f32)
    else:
        ax = jnp.dot(adj, x, preferred_element_type=f32)
        h = jnp.dot(ax.astype(bf16), w1_ref[...], preferred_element_type=f32)
    h = jnp.where(h > 0, h, 0.5 * h)          # LeakyReLU(0.5)
    # Dropout: identity in eval mode.  TODO(synk): training-mode dropout.

    # ---- gc4: (adj @ h) @ W4 -----------------------------------------------
    h16 = h.astype(bf16)
    if O < H:
        # Reassociate to adj @ (h @ W4): cheaper when outputdim < hiddendim.
        hw = jnp.dot(h16, w4_ref[...], preferred_element_type=f32)
        x2 = jnp.dot(adj, hw.astype(bf16), preferred_element_type=f32)
    else:
        ah = jnp.dot(adj, h16, preferred_element_type=f32)
        x2 = jnp.dot(ah.astype(bf16), w4_ref[...], preferred_element_type=f32)
    x2_ref[...] = x2                                           # (R, O)

    # ---- graph-level max pooling + fused proj_head --------------------------
    pooled = jnp.max(x2.reshape(BB, N, O), axis=1)             # (BB, O) f32
    p = jnp.dot(pooled.astype(bf16), pw1_ref[...],
                preferred_element_type=f32) + pb1_ref[...]
    p = jnp.maximum(p, 0.0)
    out_ref[...] = jnp.dot(p.astype(bf16), pw2_ref[...],
                           preferred_element_type=f32) + pb2_ref[...]


def _pick_batch_block(B, N, F, H, O, vmem_budget=40 * 1024 * 1024):
    """Pick graphs-per-step: fill the MXU (BB*N <= 256 rows), fit VMEM,
    and keep >= 2 grid steps when possible (two v7x TensorCores)."""
    bb = 1
    start = min(B, max(1, 256 // max(N, 1)))
    for cand in range(start, 0, -1):
        if B % cand:
            continue
        R = cand * N
        vmem = (2 * 2 * (R * R + R * F)          # double-buffered bf16 adj_bd + x
                + 4 * R * (F + H + 2 * O)        # f32 intermediates (vregs/VMEM)
                + 2 * 4 * (R * O + cand * O)     # double-buffered f32 outputs
                + 2 * (F * H + H * O + 2 * O * O))  # weights
        if vmem <= vmem_budget:
            bb = cand
            break
    if B // bb < 2 and bb % 2 == 0:
        bb //= 2                                 # keep both v7x TCs busy
    return bb


def _block_diag_adj(adj, BB):
    """(B, N, N) -> (B//BB, BB*N, BB*N) block-diagonal.  Plain XLA, host-side."""
    B, N, _ = adj.shape
    G = B // BB
    if BB == 1:
        return adj
    a = adj.reshape(G, BB, N, N)
    eye = jnp.eye(BB, dtype=adj.dtype)
    bd = jnp.einsum("gbij,bc->gbicj", a, eye)    # exact: multiply by 0/1
    return bd.reshape(G, BB * N, BB * N)


def encoder_forward(x, adj, params):
    """x: (B, N, F) float32, adj: (B, N, N) float32 -> (x2 (B,N,O), out (B,O))."""
    B, N, F = x.shape
    H = params["w1"].shape[1]
    O = params["w4"].shape[1]
    BB = _pick_batch_block(B, N, F, H, O)
    G = B // BB
    R = BB * N

    bf16 = jnp.bfloat16
    adj_bd = _block_diag_adj(adj.astype(bf16), BB)   # (G, R, R) bf16
    x_flat = x.astype(bf16).reshape(B * N, F)        # (B*N, F)  bf16
    w1 = params["w1"].astype(bf16)
    w4 = params["w4"].astype(bf16)
    pw1 = params["pw1"].astype(bf16)
    pw2 = params["pw2"].astype(bf16)
    pb1 = params["pb1"].astype(jnp.float32)
    pb2 = params["pb2"].astype(jnp.float32)

    flops = 2 * B * (N * N * F + N * F * H + N * N * H + N * H * O + 2 * O * O)
    bytes_accessed = (adj_bd.size + x_flat.size + w1.size + w4.size
                      + pw1.size + pw2.size) * 2 \
        + (pb1.size + pb2.size) * 4 + (B * N * O + B * O) * 4

    x2_slab, out = pl.pallas_call(
        _encoder_block_kernel,
        out_shape=[
            jax.ShapeDtypeStruct((B * N, O), jnp.float32),   # x2 slab
            jax.ShapeDtypeStruct((B, O), jnp.float32),       # proj_head output
        ],
        grid_spec=pltpu.PrefetchScalarGridSpec(
            num_scalar_prefetch=0,
            grid=(G,),
            in_specs=[
                pl.BlockSpec((None, R, R), lambda g: (g, 0, 0)),   # adj blockdiag
                pl.BlockSpec((R, F), lambda g: (g, 0)),            # x rows
                pl.BlockSpec((F, H), lambda g: (0, 0)),            # w1
                pl.BlockSpec((H, O), lambda g: (0, 0)),            # w4
                pl.BlockSpec((O, O), lambda g: (0, 0)),            # pw1
                pl.BlockSpec((1, O), lambda g: (0, 0)),            # pb1
                pl.BlockSpec((O, O), lambda g: (0, 0)),            # pw2
                pl.BlockSpec((1, O), lambda g: (0, 0)),            # pb2
            ],
            out_specs=[
                pl.BlockSpec((R, O), lambda g: (g, 0)),            # x2 slab
                pl.BlockSpec((BB, O), lambda g: (g, 0)),           # out
            ],
        ),
        compiler_params=pltpu.CompilerParams(
            dimension_semantics=("parallel",),
            vmem_limit_bytes=48 * 1024 * 1024,
        ),
        cost_estimate=pl.CostEstimate(
            flops=flops, transcendentals=0, bytes_accessed=bytes_accessed),
    )(adj_bd, x_flat, w1, w4, pw1, pb1, pw2, pb2)

    return x2_slab.reshape(B, N, O), out


def encoder_reference(x, adj, params):
    """Pure-JAX reference mirroring the kernel's bf16-in / f32-accumulate numerics."""
    bf16 = jnp.bfloat16
    f32 = jnp.float32
    adj_b = adj.astype(bf16)
    x_b = x.astype(bf16)
    w1 = params["w1"].astype(bf16)
    w4 = params["w4"].astype(bf16)
    F = x.shape[-1]
    H = w1.shape[1]
    O = w4.shape[1]

    if F > H:
        xw = jnp.einsum("bnf,fh->bnh", x_b, w1, preferred_element_type=f32)
        h = jnp.einsum("bnm,bmh->bnh", adj_b, xw.astype(bf16),
                       preferred_element_type=f32)
    else:
        ax = jnp.einsum("bnm,bmf->bnf", adj_b, x_b, preferred_element_type=f32)
        h = jnp.einsum("bnf,fh->bnh", ax.astype(bf16), w1,
                       preferred_element_type=f32)
    h = jnp.where(h > 0, h, 0.5 * h)
    h16 = h.astype(bf16)
    if O < H:
        hw = jnp.einsum("bnh,ho->bno", h16, w4, preferred_element_type=f32)
        x2 = jnp.einsum("bnm,bmo->bno", adj_b, hw.astype(bf16),
                        preferred_element_type=f32)
    else:
        ah = jnp.einsum("bnm,bmh->bnh", adj_b, h16, preferred_element_type=f32)
        x2 = jnp.einsum("bnh,ho->bno", ah.astype(bf16), w4,
                        preferred_element_type=f32)
    pooled = jnp.max(x2, axis=1)
    p = jnp.einsum("bo,op->bp", pooled.astype(bf16),
                   params["pw1"].astype(bf16), preferred_element_type=f32)
    p = jnp.maximum(p + params["pb1"], 0.0)
    out = jnp.einsum("bo,op->bp", p.astype(bf16),
                     params["pw2"].astype(bf16), preferred_element_type=f32)
    out = out + params["pb2"]
    return x2, out


def init_params(key, feat_size, hiddendim, outputdim):
    ks = jax.random.split(key, 6)
    scale = 0.1
    return {
        # Linear weights stored as (in, out) == W^T of the PyTorch layout.
        "w1": scale * jax.random.normal(ks[0], (feat_size, hiddendim), jnp.float32),
        "w4": scale * jax.random.normal(ks[1], (hiddendim, outputdim), jnp.float32),
        "pw1": scale * jax.random.normal(ks[2], (outputdim, outputdim), jnp.float32),
        "pb1": scale * jax.random.normal(ks[3], (1, outputdim), jnp.float32),
        "pw2": scale * jax.random.normal(ks[4], (outputdim, outputdim), jnp.float32),
        "pb2": scale * jax.random.normal(ks[5], (1, outputdim), jnp.float32),
    }


if __name__ == "__main__":
    # Small shapes: 16 graphs of 16 nodes, feat/hidden/out = 32.
    # BB = 8 graphs per grid step -> R = 128 rows per matmul, 2 grid steps
    # (keeps both v7x TensorCores busy, perfect M-fill on v5e's 128x128 MXU).
    B, N, FEAT, HID, OUT = 16, 16, 32, 32, 32

    key = jax.random.PRNGKey(0)
    k_x, k_adj, k_p = jax.random.split(key, 3)

    x = jax.random.normal(k_x, (B, N, FEAT), jnp.float32)
    # symmetric, row-normalized-ish adjacency
    a = jax.random.uniform(k_adj, (B, N, N), jnp.float32)
    adj = (a + jnp.transpose(a, (0, 2, 1))) / (2.0 * N)

    params = init_params(k_p, FEAT, HID, OUT)

    x2, out = encoder_forward(x, adj, params)
    jax.block_until_ready((x2, out))

    x2_ref, out_ref = encoder_reference(x, adj, params)
    assert jnp.allclose(x2, x2_ref, atol=1e-3, rtol=1e-2), \
        float(jnp.max(jnp.abs(x2 - x2_ref)))
    assert jnp.allclose(out, out_ref, atol=1e-3, rtol=1e-2), \
        float(jnp.max(jnp.abs(out - out_ref)))

    print("KERNEL_OK")
</pallas_src>

<mosaic_0001>
module attributes {stable_mosaic.version = 11 : i64} {
  func.func @_encoder_block_kernel(%arg0: i32, %arg1: memref<1x128x128xbf16, #tpu.memory_space<vmem>>, %arg2: memref<128x32xbf16, #tpu.memory_space<vmem>>, %arg3: memref<32x32xbf16, #tpu.memory_space<vmem>>, %arg4: memref<32x32xbf16, #tpu.memory_space<vmem>>, %arg5: memref<32x32xbf16, #tpu.memory_space<vmem>>, %arg6: memref<1x32xf32, #tpu.memory_space<vmem>>, %arg7: memref<32x32xbf16, #tpu.memory_space<vmem>>, %arg8: memref<1x32xf32, #tpu.memory_space<vmem>>, %arg9: memref<128x32xf32, #tpu.memory_space<vmem>>, %arg10: memref<8x32xf32, #tpu.memory_space<vmem>>) attributes {dimension_semantics = [#tpu.dimension_semantics<parallel>], iteration_bounds = array<i64: 2>, scalar_prefetch = 0 : i64, scratch_operands = 0 : i64, tpu.core_type = #tpu.core_type<tc>, window_params = [{transform_indices = @transform_0, window_bounds = array<i64: 1, 128, 128>}, {transform_indices = @transform_1, window_bounds = array<i64: 128, 32>}, {pipeline_mode = #tpu.pipeline_mode<synchronous>, transform_indices = @transform_2, window_bounds = array<i64: 32, 32>}, {pipeline_mode = #tpu.pipeline_mode<synchronous>, transform_indices = @transform_3, window_bounds = array<i64: 32, 32>}, {pipeline_mode = #tpu.pipeline_mode<synchronous>, transform_indices = @transform_4, window_bounds = array<i64: 32, 32>}, {pipeline_mode = #tpu.pipeline_mode<synchronous>, transform_indices = @transform_5, window_bounds = array<i64: 1, 32>}, {pipeline_mode = #tpu.pipeline_mode<synchronous>, transform_indices = @transform_6, window_bounds = array<i64: 32, 32>}, {pipeline_mode = #tpu.pipeline_mode<synchronous>, transform_indices = @transform_7, window_bounds = array<i64: 1, 32>}, {transform_indices = @transform_8, window_bounds = array<i64: 128, 32>}, {transform_indices = @transform_9, window_bounds = array<i64: 8, 32>}]} {
    %c0 = arith.constant 0 : index
    %c0_0 = arith.constant 0 : index
    %c0_1 = arith.constant 0 : index
    %0 = vector.load %arg1[%c0, %c0_0, %c0_1] : memref<1x128x128xbf16, #tpu.memory_space<vmem>>, vector<1x128x128xbf16>
    %1 = vector.shape_cast %0 : vector<1x128x128xbf16> to vector<128x128xbf16>
    %c0_2 = arith.constant 0 : index
    %c0_3 = arith.constant 0 : index
    %2 = vector.load %arg2[%c0_2, %c0_3] : memref<128x32xbf16, #tpu.memory_space<vmem>>, vector<128x32xbf16>
    %cst = arith.constant dense<0.000000e+00> : vector<128x32xf32>
    %3 = tpu.matmul %1, %2, %cst {dimension_numbers = #tpu.dot_dimension_numbers<[1], [0], [0], [1], [0, 0, 1, 1], [], []>} : vector<128x128xbf16>, vector<128x32xbf16>, vector<128x32xf32> -> vector<128x32xf32>
    %4 = arith.truncf %3 : vector<128x32xf32> to vector<128x32xbf16>
    %c0_4 = arith.constant 0 : index
    %c0_5 = arith.constant 0 : index
    %5 = vector.load %arg3[%c0_4, %c0_5] : memref<32x32xbf16, #tpu.memory_space<vmem>>, vector<32x32xbf16>
    %cst_6 = arith.constant dense<0.000000e+00> : vector<128x32xf32>
    %6 = tpu.matmul %4, %5, %cst_6 {dimension_numbers = #tpu.dot_dimension_numbers<[1], [0], [0], [1], [0, 0, 1, 1], [], []>} : vector<128x32xbf16>, vector<32x32xbf16>, vector<128x32xf32> -> vector<128x32xf32>
    %cst_7 = arith.constant 0.000000e+00 : f32
    %7 = vector.broadcast %cst_7 : f32 to vector<128x32xf32>
    %8 = arith.cmpf ogt, %6, %7 : vector<128x32xf32>
    %cst_8 = arith.constant 5.000000e-01 : f32
    %9 = vector.broadcast %cst_8 : f32 to vector<128x32xf32>
    %10 = arith.mulf %9, %6 : vector<128x32xf32>
    %11 = arith.select %8, %6, %10 : vector<128x32xi1>, vector<128x32xf32>
    %12 = arith.truncf %11 : vector<128x32xf32> to vector<128x32xbf16>
    %cst_9 = arith.constant dense<0.000000e+00> : vector<128x32xf32>
    %13 = tpu.matmul %1, %12, %cst_9 {dimension_numbers = #tpu.dot_dimension_numbers<[1], [0], [0], [1], [0, 0, 1, 1], [], []>} : vector<128x128xbf16>, vector<128x32xbf16>, vector<128x32xf32> -> vector<128x32xf32>
    %14 = arith.truncf %13 : vector<128x32xf32> to vector<128x32xbf16>
    %c0_10 = arith.constant 0 : index
    %c0_11 = arith.constant 0 : index
    %15 = vector.load %arg4[%c0_10, %c0_11] : memref<32x32xbf16, #tpu.memory_space<vmem>>, vector<32x32xbf16>
    %cst_12 = arith.constant dense<0.000000e+00> : vector<128x32xf32>
    %16 = tpu.matmul %14, %15, %cst_12 {dimension_numbers = #tpu.dot_dimension_numbers<[1], [0], [0], [1], [0, 0, 1, 1], [], []>} : vector<128x32xbf16>, vector<32x32xbf16>, vector<128x32xf32> -> vector<128x32xf32>
    %c0_13 = arith.constant 0 : index
    %c0_14 = arith.constant 0 : index
    %17 = vector.load %arg9[%c0_13, %c0_14] : memref<128x32xf32, #tpu.memory_space<vmem>>, vector<128x32xf32>
    tpu.vector_store %arg9[%c0_13, %c0_14], %16 {strides = array<i32>} : memref<128x32xf32, #tpu.memory_space<vmem>>, vector<128x32xf32>,
    %18 = vector.shape_cast %16 : vector<128x32xf32> to vector<8x16x32xf32>
    %cst_15 = arith.constant dense<0xFF800000> : vector<8x32xf32>
    %19 = vector.multi_reduction <maximumf>, %18, %cst_15 [1] : vector<8x16x32xf32> to vector<8x32xf32>
    %20 = arith.truncf %19 : vector<8x32xf32> to vector<8x32xbf16>
    %c0_16 = arith.constant 0 : index
    %c0_17 = arith.constant 0 : index
    %21 = vector.load %arg5[%c0_16, %c0_17] : memref<32x32xbf16, #tpu.memory_space<vmem>>, vector<32x32xbf16>
    %cst_18 = arith.constant dense<0.000000e+00> : vector<8x32xf32>
    %22 = tpu.matmul %20, %21, %cst_18 {dimension_numbers = #tpu.dot_dimension_numbers<[1], [0], [0], [1], [0, 0, 1, 1], [], []>} : vector<8x32xbf16>, vector<32x32xbf16>, vector<8x32xf32> -> vector<8x32xf32>
    %c0_19 = arith.constant 0 : index
    %c0_20 = arith.constant 0 : index
    %23 = vector.load %arg6[%c0_19, %c0_20] : memref<1x32xf32, #tpu.memory_space<vmem>>, vector<1x32xf32>
    %24 = vector.broadcast %23 : vector<1x32xf32> to vector<8x32xf32>
    %25 = arith.addf %22, %24 : vector<8x32xf32>
    %cst_21 = arith.constant 0.000000e+00 : f32
    %26 = vector.broadcast %cst_21 : f32 to vector<8x32xf32>
    %27 = arith.maximumf %25, %26 : vector<8x32xf32>
    %28 = arith.truncf %27 : vector<8x32xf32> to vector<8x32xbf16>
    %c0_22 = arith.constant 0 : index
    %c0_23 = arith.constant 0 : index
    %29 = vector.load %arg7[%c0_22, %c0_23] : memref<32x32xbf16, #tpu.memory_space<vmem>>, vector<32x32xbf16>
    %cst_24 = arith.constant dense<0.000000e+00> : vector<8x32xf32>
    %30 = tpu.matmul %28, %29, %cst_24 {dimension_numbers = #tpu.dot_dimension_numbers<[1], [0], [0], [1], [0, 0, 1, 1], [], []>} : vector<8x32xbf16>, vector<32x32xbf16>, vector<8x32xf32> -> vector<8x32xf32>
    %c0_25 = arith.constant 0 : index
    %c0_26 = arith.constant 0 : index
    %31 = vector.load %arg8[%c0_25, %c0_26] : memref<1x32xf32, #tpu.memory_space<vmem>>, vector<1x32xf32>
    %32 = vector.broadcast %31 : vector<1x32xf32> to vector<8x32xf32>
    %33 = arith.addf %30, %32 : vector<8x32xf32>
    %c0_27 = arith.constant 0 : index
    %c0_28 = arith.constant 0 : index
    %34 = vector.load %arg10[%c0_27, %c0_28] : memref<8x32xf32, #tpu.memory_space<vmem>>, vector<8x32xf32>
    tpu.vector_store %arg10[%c0_27, %c0_28], %33 {strides = array<i32>} : memref<8x32xf32, #tpu.memory_space<vmem>>, vector<8x32xf32>,
    return
  }
  func.func @transform_0(%arg0: i32) -> (i32, i32, i32) {
    %c0_i32 = arith.constant 0 : i32
    %c0_i32_0 = arith.constant 0 : i32
    %c0_i32_1 = arith.constant 0 : i32
    return %arg0, %c0_i32, %c0_i32_0 : i32, i32, i32
  }
  func.func @transform_1(%arg0: i32) -> (i32, i32) {
    %c0_i32 = arith.constant 0 : i32
    %c0_i32_0 = arith.constant 0 : i32
    return %arg0, %c0_i32 : i32, i32
  }
  func.func @transform_2(%arg0: i32) -> (i32, i32) {
    %c0_i32 = arith.constant 0 : i32
    %c0_i32_0 = arith.constant 0 : i32
    %c0_i32_1 = arith.constant 0 : i32
    return %c0_i32, %c0_i32_0 : i32, i32
  }
  func.func @transform_3(%arg0: i32) -> (i32, i32) {
    %c0_i32 = arith.constant 0 : i32
    %c0_i32_0 = arith.constant 0 : i32
    %c0_i32_1 = arith.constant 0 : i32
    return %c0_i32, %c0_i32_0 : i32, i32
  }
  func.func @transform_4(%arg0: i32) -> (i32, i32) {
    %c0_i32 = arith.constant 0 : i32
    %c0_i32_0 = arith.constant 0 : i32
    %c0_i32_1 = arith.constant 0 : i32
    return %c0_i32, %c0_i32_0 : i32, i32
  }
  func.func @transform_5(%arg0: i32) -> (i32, i32) {
    %c0_i32 = arith.constant 0 : i32
    %c0_i32_0 = arith.constant 0 : i32
    %c0_i32_1 = arith.constant 0 : i32
    return %c0_i32, %c0_i32_0 : i32, i32
  }
  func.func @transform_6(%arg0: i32) -> (i32, i32) {
    %c0_i32 = arith.constant 0 : i32
    %c0_i32_0 = arith.constant 0 : i32
    %c0_i32_1 = arith.constant 0 : i32
    return %c0_i32, %c0_i32_0 : i32, i32
  }
  func.func @transform_7(%arg0: i32) -> (i32, i32) {
    %c0_i32 = arith.constant 0 : i32
    %c0_i32_0 = arith.constant 0 : i32
    %c0_i32_1 = arith.constant 0 : i32
    return %c0_i32, %c0_i32_0 : i32, i32
  }
  func.func @transform_8(%arg0: i32) -> (i32, i32) {
    %c0_i32 = arith.constant 0 : i32
    %c0_i32_0 = arith.constant 0 : i32
    return %arg0, %c0_i32 : i32, i32
  }
  func.func @transform_9(%arg0: i32) -> (i32, i32) {
    %c0_i32 = arith.constant 0 : i32
    %c0_i32_0 = arith.constant 0 : i32
    return %arg0, %c0_i32 : i32, i32
  }
}

</mosaic_0001>

<bundles_post_ra>
// kernel: tpu_custom_call.1
= control target key start
LH: loop header
LB: loop body
LE: loop exit
PB: predicated region body
PF: predicated region fallthrough
CT: control target
= control target key end

     0   :  { %15 = vsyncpa [#allocation3], 0  ;;  %s2292_s0 = inlined_call_operand.vmem [shape: bf16[2,128,128], index: 0, kind: input, shape index: {}]   ;;  %s2293_s1 = inlined_call_operand.vmem [shape: bf16[256,32], index: 1, kind: input, shape index: {}]   ;;  %s2294_s2 = inlined_call_operand.vmem [shape: bf16[32,32], index: 2, kind: input, shape index: {}]   ;;  %s2295_s3 = inlined_call_operand.vmem [shape: bf16[32,32], index: 3, kind: input, shape index: {}]   ;;  %s2296_s4 = inlined_call_operand.hbm [shape: bf16[32,32], index: 4, kind: input, shape index: {}]   ;;  %s2297_s5 = inlined_call_operand.vmem [shape: f32[1,32], index: 5, kind: input, shape index: {}]   ;;  %s2298_s6 = inlined_call_operand.hbm [shape: bf16[32,32], index: 6, kind: input, shape index: {}]   ;;  %s2299_s7 = inlined_call_operand.vmem [shape: f32[1,32], index: 7, kind: input, shape index: {}]   ;;  %s2300_s8 = inlined_call_operand.vmem [shape: f32[256,32], index: 8, kind: output, shape index: {0}]   ;;  %s2301_s9 = inlined_call_operand.hbm [shape: f32[16,32], index: 9, kind: output, shape index: {1}]  }
   0x1   :  { %16 = vsyncpa [#allocation6], 0 }
   0x2   :  { %17 = vsyncpa [#allocation4], 0 }
   0x3   :  { %19 = vsyncpa [#allocation4 + $0x1], 0  ;;  %s1979_s30 = smov 0   ;;  %s1981_s10 = smov 0  }
   0x4   :  { %s1983_s11 = smov 0   ;;  %s1985_s12 = smov 0  }
   0x5 LB: > { %s2000_s13 = sadd.s32 4294967295, %s1920_s12   ;;  %s1470_s14 = sadd.s32 4294967294, %s1920_s12   ;;  %s1920_s12 = sphi %s1985_s12, %s2315_s12   ;;  %s1916_s11 = sphi %s1983_s11, %s2314_s11   ;;  %s1912_s10 = sphi %s1981_s10, %s2313_s10   ;;  %s1908_s30 = sphi %s1979_s30, %s2312_s30  }
   0x6   : > { %s2004_s15 = sadd.s32 1, %s1920_s12   ;;  %s236_s16 = sadd.s32 1, %s1916_s11 }
   0x7   : > { %s233_s17 = ssub.s32 %s1920_s12, %s2004_s15  ;;  %p246_p0 = scmp.ne.s32.totalorder %s1916_s11, %s1912_s10 }
   0x8   : > { %p234_p1 = scmp.eq.s32.totalorder %s233_s17, 0  ;;  %p247_p2 = scmp.eq.s32.totalorder %s2000_s13, 1 }
   0x9   : > { %p252_p3 = scmp.ne.s32.totalorder %s1912_s10, %s1908_s30  ;;  %p253_p4 = scmp.eq.s32.totalorder %s1470_s14, 1 }
   0xa   : > { %s2015_s18 = scalar_select %p234_p1, %s1916_s11, %s236_s16  }
   0xb   : > { %p2017_p5 = por %p247_p2, %p246_p0  ;;  %p2021_p6 = por %p253_p4, %p252_p3 }
   0xc   : > { %p1471_p7 = scmp.ge.s32.totalorder %s1920_s12, 1  ;;  %p260_p8 = scmp.lt.s32.totalorder %s1920_s12, 3 }
   0xd   : > { %s2304_s20 = scalar_select %p2021_p6, 1, 0 }
   0xe   : > { %p2302_p9 = scmp.eq.s32.totalorder %s2000_s13, 0  ;;  %p2028_p10 = pnand %p1471_p7, %p260_p8 }
   0xf   : > { %s1922_s22 = smov [#allocation2]   ;;  %s1923_s25 = smov [#allocation5]  }
  0x10   : > { %s278_s23 = sshll.u32 %s1922_s22, 4  ;;  %p1722_p11 = pneg %p2028_p10  ;;  %s279_s23 = int_to_ptr.vmem [resolvable:$true] %s278_s23 }
  0x11   : > { %s294_s26 = sshll.u32 %s1923_s25, 4  ;;  %s1811_s27 = scalar_lea.vmem %s279_s23, 256  ;;  %s295_s26 = int_to_ptr.vmem [resolvable:$true] %s294_s26 }
  0x12   : > { %p2036_p12 = pnand %p2302_p9, %p1722_p11  ;;  %p1812_p0 = scmp.ne.s32.totalorder %s279_s23, %s1811_s27 }
  0x13   : > { %p1819_p3 = scmp.lt.s32.totalorder %s279_s23, %s279_s23  ;;  %p1820_p4 = scmp.lt.s32.totalorder %s1811_s27, %s1811_s27 }
  0x14   : > { %p1802_p13 = pneg %p2036_p12 }
  0x15   : > { %p1821_p7 = por %p1820_p4, %p1819_p3 }
  0x16   : > { %p1814_p1 = pnand %p1812_p0, %p1802_p13 }
  0x18   : > { %p1815_p2 = pneg %p1814_p1 }
  0x1a   : > { %p1822_p8 = pnand %p1821_p7, %p1815_p2 }
  0x1c   : > { %1825 = shalt.err (!%p1822_p8)
}
  0x1d   : > { %s1924_s28 = smov 64   ;;  %s1925_s29 = smov 4  }
  0x1e   : > { %1725 = dma.hbm_to_vmem [thread:$0]  (!%p2036_p12), %s2296_s4, 256, %s279_s23, [#allocation3], %s1924_s28, %s1924_s28, %s1925_s29  }
  0x1f   : > { %s1837_s17 = scalar_lea.vmem %s295_s26, 256  ;;  %p1845_p9 = scmp.lt.s32.totalorder %s295_s26, %s295_s26 }
  0x20   : > { %p1838_p11 = scmp.ne.s32.totalorder %s295_s26, %s1837_s17  ;;  %p1846_p6 = scmp.lt.s32.totalorder %s1837_s17, %s1837_s17 }
  0x22   : > { %p1840_p0 = pnand %p1838_p11, %p1802_p13  ;;  %p1847_p3 = por %p1846_p6, %p1845_p9 }
  0x24   : > { %p1841_p1 = pneg %p1840_p0 }
  0x26   : > { %p1848_p2 = pnand %p1847_p3, %p1841_p1 }
  0x28   : > { %1851 = shalt.err (!%p1848_p2)
}
  0x29   : > { %1728 = dma.hbm_to_vmem [thread:$0]  (!%p2036_p12), %s2298_s6, 256, %s295_s26, [#allocation6], %s1924_s28, %s1924_s28, %s1925_s29  }
  0x2a   : > { %330 = sbr.rel (%p2028_p10) target bundleno = 1406 (0x57e), region = 52  ;;  %p2307_p4 = scmp.eq.s32.totalorder (!%p2028_p10), %s2000_s13, 0 }
  0x2f   : > { %1895 = dma.done.wait (%p2307_p4), [#allocation3], 256   ;;  %p2308_p13 = pmov %p2307_p4 }
  0x30   : > { %p2309_p7 = pmov %p2307_p4 }
  0x31   : > { %1897 = vsyncadd (%p2308_p13), [#allocation3], 4294967040 }
  0x32   : > { %1899 = dma.done.wait (%p2309_p7), [#allocation6], 256   ;;  %p2310_p6 = pmov %p2307_p4 }
  0x33   : > { %s1481_s23 = sshll.u32 %s2000_s13, 4  ;;  %p380_p9 = scmp.lt.s32.totalorder %s2000_s13, 1  ;;  %v1792_v16 = vld [vmem:[%s2294_s2 + $0x8] sm:$0xff]   ;;  %v1793_v17 = vld [vmem:[%s2294_s2] sm:$0xff]   ;;  %vm647_vm0 = vcmask 261120  }
  0x34   : > { %1901 = vsyncadd (%p2310_p6), [#allocation6], 4294967040  ;;  %p386_p12 = scmp.lt.s32.totalorder %s1481_s23, 31  ;;  %1624 = vmatprep.subr.bf16.mxu1 %v1792_v16  ;;  %v1794_v42 = vld [vmem:[%s2295_s3 + $0x8] sm:$0xff]   ;;  %v1795_v43 = vld [vmem:[%s2295_s3] sm:$0xff]   ;;  %s1928_s25 = smov [#allocation7]  }
  0x35   : > { %s381_s21 = scalar_select %p380_p9, %s2000_s13, 1  ;;  %1625 = vmatpush3.bf16.msra.mxu1 %v1792_v16 }
  0x36   : > { %s2317_s23 = smov (!%p386_p12, %s1481_s23), 31  ;;  %1626 = vmatprep.subr.bf16.mxu1 %v1793_v17 }
  0x37   : > { %s1482_s24 = sshll.u32 %s2317_s23, 2  ;;  %s1533_s29 = sshll.u32 %s381_s21, 6 }
  0x38   : > { %s389_s28 = scalar_lea.vmem %s2293_s1, %s1482_s24  ;;  %s2080_s17 = scalar_lea.vmem %s2292_s0, %s1533_s29 }
  0x39   : > { %v1776_v0 = vld [vmem:[%s389_s28 + $0x38] sm:$0xff]   ;;  %v1777_v1 = vld [vmem:[%s389_s28 + $0x30] sm:$0xff]   ;;  %v1778_v2 = vld [vmem:[%s389_s28 + $0x28] sm:$0xff]   ;;  %1627 = vmatpush3.bf16.msra.mxu1 %v1793_v17  ;;  %s1484_s14 = sshll.u32 %s2317_s23, 3  ;;  %s377_s21 = sand.u32 1, %s1912_s10  }
  0x3a   : > { %1592 = vmatprep.subr.bf16.mxu0 %v1776_v0  ;;  %v1779_v3 = vld [vmem:[%s389_s28 + $0x20] sm:$0xff]   ;;  %v1780_v5 = vld [vmem:[%s389_s28 + $0x18] sm:$0xff]   ;;  %v1781_v6 = vld [vmem:[%s389_s28 + $0x10] sm:$0xff]   ;;  %s2184_s22 = scalar_lea.vmem %s2300_s8, %s1484_s14  ;;  %s1478_s24 = sshll.u32 %s377_s21, 3 }
  0x3b   : > { %1593 = vmatpush3.bf16.msra.mxu0 %v1776_v0  ;;  %v2083_v4 = vld [vmem:[%s2080_s17] sm:$0xff]   ;;  %v1782_v7 = vld [vmem:[%s389_s28 + $0x8] sm:$0xff]   ;;  %v2090_v10 = vld [vmem:[%s2080_s17 + $0x10] sm:$0xff]   ;;  %s379_s29 = scalar_lea.vmem [#allocation7], %s1478_s24  ;;  %s1335_s23 = scalar_lea.sflag [#allocation4], %s377_s21 }
  0x3c   : > { %1594 = vmatprep.subr.bf16.mxu0 %v1777_v1  ;;  %1608 = vmatprep.mubr.bf16.mxu0 %v2083_v4  ;;  %v1783_v8 = vld [vmem:[%s389_s28] sm:$0xff]   ;;  %v2087_v9 = vld [vmem:[%s2080_s17 + $0x8] sm:$0xff]   ;;  %v2095_v11 = vld [vmem:[%s2080_s17 + $0x18] sm:$0xff]   ;;  %s1530_s28 = sshll.u32 %s2000_s13, 7  ;;  %s1352_s14 = sshll.u32 %s379_s29, 4  ;;  %s2252_s14 = int_to_ptr.vmem [resolvable:$true] %s1352_s14 }
  0x3d   : > { %v2098_v12 = vld [vmem:[%s2080_s17 + $0x20] sm:$0xff]   ;;  %v2103_v13 = vld [vmem:[%s2080_s17 + $0x28] sm:$0xff]   ;;  %v2106_v14 = vld [vmem:[%s2080_s17 + $0x30] sm:$0xff]   ;;  %s1852_s13 = scalar_lea.vmem %s2252_s14, 128  ;;  %s1856_s24 = sshll.u32 %s1928_s25, 4  ;;  %s1857_s24 = int_to_ptr.vmem [resolvable:$false] %s1856_s24 }
  0x3e   : > { %v2111_v15 = vld [vmem:[%s2080_s17 + $0x38] sm:$0xff]   ;;  %p1853_p10 = scmp.ne.s32.totalorder %s2252_s14, %s1852_s13  ;;  %s1858_s26 = scalar_lea.vmem %s1857_s24, 256 }
  0x3f   : > { %1595 = vmatpush3.bf16.msra.mxu0 %v1777_v1  ;;  %p1859_p0 = scmp.lt.s32.totalorder %s2252_s14, %s1857_s24  ;;  %p1860_p1 = scmp.lt.s32.totalorder %s1858_s26, %s1852_s13 }
  0x40   : > { %1596 = vmatprep.subr.bf16.mxu0 %v1778_v2  ;;  %p1854_p8 = pnand %p1853_p10, %p2017_p5 }
  0x41   : > { %p1861_p3 = por %p1860_p1, %p1859_p0 }
  0x42   : > { %p1855_p11 = pneg %p1854_p8 }
  0x43   : > { %1597 = vmatpush3.bf16.msra.mxu0 %v1778_v2 }
  0x44   : > { %1598 = vmatprep.subr.bf16.mxu0 %v1779_v3  ;;  %p1862_p2 = pnand %p1861_p3, %p1855_p11 }
  0x47   : > { %1599 = vmatpush3.bf16.msra.mxu0 %v1779_v3 }
  0x48   : > { %1600 = vmatprep.subr.bf16.mxu0 %v1780_v5 }
  0x4b   : > { %1601 = vmatpush3.bf16.msra.mxu0 %v1780_v5 }
  0x4c   : > { %1602 = vmatprep.subr.bf16.mxu0 %v1781_v6 }
  0x4f   : > { %1603 = vmatpush3.bf16.msra.mxu0 %v1781_v6 }
  0x50   : > { %1604 = vmatprep.subr.bf16.mxu0 %v1782_v7 }
  0x53   : > { %1605 = vmatpush3.bf16.msra.mxu0 %v1782_v7 }
  0x54   : > { %1606 = vmatprep.subr.bf16.mxu0 %v1783_v8 }
  0x57   : > { %1607 = vmatpush3.bf16.msra.mxu0 %v1783_v8 }
  0x58   : > { %1676 = vmatprep.subr.bf16.mxu0 %v1794_v42 }
  0x5a   : > { %1609 = vmatmul.mubr.bf16.vlgmr.msra.gmra.mxu0 %v2087_v9 }
  0x5b   : > { %1612 = vmatprep.mubr.bf16.mxu0 %v2090_v10  ;;  %1677 = vmatpush3.bf16.msra.mxu0 %v1794_v42 }
  0x5c   : > { %1678 = vmatprep.subr.bf16.mxu0 %v1795_v43 }
  0x5f   : > { %1679 = vmatpush3.bf16.msra.mxu0 %v1795_v43 }
  0x62   : > { %1613 = vmatmul.mubr.bf16.gmra.mxu0 %v2095_v11 }
  0x63   : > { %1616 = vmatprep.mubr.bf16.mxu0 %v2098_v12 }
  0x6a   : > { %1617 = vmatmul.mubr.bf16.gmra.mxu0 %v2103_v13 }
  0x6b   : > { %1620 = vmatprep.mubr.bf16.mxu0 %v2106_v14 }
  0x72   : > { %1621 = vmatmul.mubr.bf16.gmra.mxu0 %v2111_v15 }
 0x11a   : > { %v1610_v18 = vpop.f32.mrf.mxu0 }
 0x11c   : > { %v560_v19 = vpop.f32.mrf.mxu0 }
 0x11e   : > { %v1611_v20 = vpop.f32.mrf.mxu0 }
 0x11f   : > { %v624_v23 = vpack.c.bf16 %v1611_v20, %v1610_v18 }
 0x120   : > { %v563_v21 = vpop.f32.mrf.mxu0 }
 0x121   : > { %v623_v22 = vpack.c.bf16 %v563_v21, %v560_v19 }
 0x122   : > { %v1614_v24 = vpop.f32.mrf.mxu0 }
 0x123   : > { %1628 = vmatprep.mubr.msk.bf16.mxu1 %vm647_vm0, %v623_v22 }
 0x124   : > { %v576_v25 = vpop.f32.mrf.mxu0  ;;  %1629 = vmatmul.mubr.msk.bf16.vlgmr.msra.gmra.mxu1 %vm647_vm0, %v624_v23 }
 0x126   : > { %v1615_v26 = vpop.f32.mrf.mxu0 }
 0x127   : > { %v626_v29 = vpack.c.bf16 %v1615_v26, %v1614_v24 }
 0x128   : > { %v579_v27 = vpop.f32.mrf.mxu0 }
 0x129   : > { %v625_v28 = vpack.c.bf16 %v579_v27, %v576_v25 }
 0x12a   : > { %v1618_v30 = vpop.f32.mrf.mxu0 }
 0x12b   : > { %1632 = vmatprep.mubr.msk.bf16.mxu1 %vm647_vm0, %v625_v28 }
 0x12c   : > { %v592_v31 = vpop.f32.mrf.mxu0  ;;  %1633 = vmatmul.mubr.msk.bf16.gmra.mxu1 %vm647_vm0, %v626_v29 }
 0x12e   : > { %v1619_v32 = vpop.f32.mrf.mxu0 }
 0x12f   : > { %v628_v35 = vpack.c.bf16 %v1619_v32, %v1618_v30 }
 0x130   : > { %v595_v33 = vpop.f32.mrf.mxu0 }
 0x131   : > { %v627_v34 = vpack.c.bf16 %v595_v33, %v592_v31 }
 0x132   : > { %v1622_v36 = vpop.f32.mrf.mxu0 }
 0x133   : > { %1636 = vmatprep.mubr.msk.bf16.mxu1 %vm647_vm0, %v627_v34 }
 0x134   : > { %v608_v37 = vpop.f32.mrf.mxu0  ;;  %1637 = vmatmul.mubr.msk.bf16.gmra.mxu1 %vm647_vm0, %v628_v35 }
 0x136   : > { %v1623_v38 = vpop.f32.mrf.mxu0 }
 0x137   : > { %v630_v41 = vpack.c.bf16 %v1623_v38, %v1622_v36 }
 0x138   : > { %v611_v39 = vpop.f32.mrf.mxu0 }
 0x139   : > { %v629_v40 = vpack.c.bf16 %v611_v39, %v608_v37 }
 0x13b   : > { %1640 = vmatprep.mubr.msk.bf16.mxu1 %vm647_vm0, %v629_v40 }
 0x13c   : > { %1641 = vmatmul.mubr.msk.bf16.gmra.mxu1 %vm647_vm0, %v630_v41 }
 0x13d   : > { %1660 = vmatprep.mubr.bf16.mxu1 %v2083_v4 }
 0x1e4   : > { %v2135_v44 = vpop.f32.mrf.mxu1 }
 0x1e5   : > { %v787_v32 = vmul.f32 0.5, %v2135_v44  ;;  %vm771_vm14 = vcmp.gt.f32.partialorder %v2135_v44, 0.0 }
 0x1e6   : > { %v2137_v45 = vpop.f32.mrf.mxu1 }
 0x1e7   : > { %v803_v37 = vsel %vm771_vm14, %v2135_v44, %v787_v32  ;;  %v785_v38 = vmul.f32 0.5, %v2137_v45 }
 0x1e8   : > { %v2139_v46 = vpop.f32.mrf.mxu1 }
 0x1e9   : > { %v788_v30 = vmul.f32 0.5, %v2139_v46  ;;  %vm772_vm13 = vcmp.gt.f32.partialorder %v2139_v46, 0.0 }
 0x1ea   : > { %v2141_v47 = vpop.f32.mrf.mxu1 }
 0x1eb   : > { %v804_v35 = vsel %vm772_vm13, %v2139_v46, %v788_v30  ;;  %v786_v36 = vmul.f32 0.5, %v2141_v47  ;;  %vm770_vm15 = vcmp.gt.f32.partialorder %v2141_v47, 0.0 }
 0x1ec   : > { %v1634_v48 = vpop.f32.mrf.mxu1  ;;  %v818_v39 = vpack.c.bf16 %v804_v35, %v803_v37 }
 0x1ed   : > { %v791_v22 = vmul.f32 0.5, %v1634_v48  ;;  %vm775_vm10 = vcmp.gt.f32.partialorder %v1634_v48, 0.0  ;;  %v802_v40 = vsel %vm770_vm15, %v2141_v47, %v786_v36 }
 0x1ee   : > { %v2143_v49 = vpop.f32.mrf.mxu1 }
 0x1ef   : > { %v807_v27 = vsel %vm775_vm10, %v1634_v48, %v791_v22  ;;  %v789_v28 = vmul.f32 0.5, %v2143_v49  ;;  %vm773_vm12 = vcmp.gt.f32.partialorder %v2143_v49, 0.0 }
 0x1f0   : > { %v1635_v50 = vpop.f32.mrf.mxu1 }
 0x1f1   : > { %v792_v20 = vmul.f32 0.5, %v1635_v50  ;;  %vm776_vm9 = vcmp.gt.f32.partialorder %v1635_v50, 0.0  ;;  %v805_v33 = vsel %vm773_vm12, %v2143_v49, %v789_v28 }
 0x1f2   : > { %v725_v51 = vpop.f32.mrf.mxu1 }
 0x1f3   : > { %v808_v25 = vsel %vm776_vm9, %v1635_v50, %v792_v20  ;;  %v790_v26 = vmul.f32 0.5, %v725_v51  ;;  %vm774_vm11 = vcmp.gt.f32.partialorder %v725_v51, 0.0  ;;  %vm1202_vm9 = vcmask 1047559  }
 0x1f4   : > { %v1638_v52 = vpop.f32.mrf.mxu1  ;;  %v820_v29 = vpack.c.bf16 %v808_v25, %v807_v27 }
 0x1f5   : > { %v795_v4 = vmul.f32 0.5, %v1638_v52  ;;  %vm779_vm6 = vcmp.gt.f32.partialorder %v1638_v52, 0.0  ;;  %v806_v31 = vsel %vm774_vm11, %v725_v51, %v790_v26 }
 0x1f6   : > { %v738_v53 = vpop.f32.mrf.mxu1  ;;  %v819_v34 = vpack.c.bf16 %v806_v31, %v805_v33 }
 0x1f7   : > { %v811_v17 = vsel %vm779_vm6, %v1638_v52, %v795_v4  ;;  %v793_v18 = vmul.f32 0.5, %v738_v53  ;;  %vm777_vm8 = vcmp.gt.f32.partialorder %v738_v53, 0.0  ;;  %vm1196_vm6 = vcmask 1044484  }
 0x1f8   : > { %v1639_v54 = vpop.f32.mrf.mxu1 }
 0x1f9   : > { %v796_v62 = vmul.f32 0.5, %v1639_v54  ;;  %vm780_vm5 = vcmp.gt.f32.partialorder %v1639_v54, 0.0  ;;  %v809_v23 = vsel %vm777_vm8, %v738_v53, %v793_v18  ;;  %vm1200_vm8 = vcmask 1046534  }
 0x1fa   : > { %v741_v55 = vpop.f32.mrf.mxu1 }
 0x1fb   : > { %v812_v8 = vsel %vm780_vm5, %v1639_v54, %v796_v62  ;;  %v794_v16 = vmul.f32 0.5, %v741_v55  ;;  %vm778_vm7 = vcmp.gt.f32.partialorder %v741_v55, 0.0  ;;  %v1797_v62 = vld [vmem:[#allocation2] sm:$0xff]   ;;  %vm1194_vm5 = vcmask 1043459  }
 0x1fc   : > { %v1642_v56 = vpop.f32.mrf.mxu1  ;;  %v822_v19 = vpack.c.bf16 %v812_v8, %v811_v17 }
 0x1fd   : > { %v799_v58 = vmul.f32 0.5, %v1642_v56  ;;  %vm783_vm1 = vcmp.gt.f32.partialorder %v1642_v56, 0.0  ;;  %v810_v21 = vsel %vm778_vm7, %v741_v55, %v794_v16  ;;  %vm1198_vm7 = vcmask 1045509  }
 0x1fe   : > { %v754_v57 = vpop.f32.mrf.mxu1  ;;  %v821_v24 = vpack.c.bf16 %v810_v21, %v809_v23 }
 0x1ff   : > { %v797_v60 = vmul.f32 0.5, %v754_v57  ;;  %vm781_vm3 = vcmp.gt.f32.partialorder %v754_v57, 0.0  ;;  %v815_v0 = vsel %vm783_vm1, %v1642_v56, %v799_v58  ;;  %vm769_vm1 = vcmp.gt.f32.partialorder %v2137_v45, 0.0 }
 0x200   : > { %v1643_v59 = vpop.f32.mrf.mxu1  ;;  %v801_v41 = vsel %vm769_vm1, %v2137_v45, %v785_v38 }
 0x201   : > { %vm784_vm2 = vcmp.gt.f32.partialorder %v1643_v59, 0.0  ;;  %v800_v61 = vmul.f32 0.5, %v1643_v59  ;;  %v813_v5 = vsel %vm781_vm3, %v754_v57, %v797_v60  ;;  %v817_v42 = vpack.c.bf16 %v802_v40, %v801_v41  ;;  %v1796_v60 = vld [vmem:[#allocation2 + $0x8] sm:$0xff]  }
 0x202   : > { %v757_v63 = vpop.f32.mrf.mxu1  ;;  %vm1190_vm3 = vcmask 1041409  }
 0x203   : > { %v816_v1 = vsel %vm784_vm2, %v1643_v59, %v800_v61  ;;  %vm782_vm4 = vcmp.gt.f32.partialorder %v757_v63, 0.0  ;;  %v798_v2 = vmul.f32 0.5, %v757_v63  ;;  %v1926_v61 = vmov 0.0  }
 0x204   : > { %v824_v3 = vpack.c.bf16 %v816_v1, %v815_v0  ;;  %vm1927_vm2 = vmmov 0  }
 0x205   : > { %v814_v6 = vsel %vm782_vm4, %v757_v63, %v798_v2  ;;  %vm1192_vm4 = vcmask 1042434  }
 0x206   : > { %1644 = vmatprep.subr.bf16.mxu1 %v824_v3  ;;  %v823_v7 = vpack.c.bf16 %v814_v6, %v813_v5 }
 0x207   : > { %1645 = vmatpush3.bf16.msra.mxu1 %v824_v3 }
 0x208   : > { %1646 = vmatprep.subr.bf16.mxu1 %v823_v7 }
 0x20b   : > { %1647 = vmatpush3.bf16.msra.mxu1 %v823_v7 }
 0x20c   : > { %1648 = vmatprep.subr.bf16.mxu1 %v822_v19 }
 0x20f   : > { %1649 = vmatpush3.bf16.msra.mxu1 %v822_v19 }
 0x210   : > { %1650 = vmatprep.subr.bf16.mxu1 %v821_v24 }
 0x213   : > { %1651 = vmatpush3.bf16.msra.mxu1 %v821_v24 }
 0x214   : > { %1652 = vmatprep.subr.bf16.mxu1 %v820_v29 }
 0x217   : > { %1653 = vmatpush3.bf16.msra.mxu1 %v820_v29 }
 0x218   : > { %1654 = vmatprep.subr.bf16.mxu1 %v819_v34 }
 0x21b   : > { %1655 = vmatpush3.bf16.msra.mxu1 %v819_v34 }
 0x21c   : > { %1656 = vmatprep.subr.bf16.mxu1 %v818_v39 }
 0x21f   : > { %1657 = vmatpush3.bf16.msra.mxu1 %v818_v39 }
 0x220   : > { %1658 = vmatprep.subr.bf16.mxu1 %v817_v42 }
 0x223   : > { %1659 = vmatpush3.bf16.msra.mxu1 %v817_v42 }
 0x224   : > { %1696 = vmatprep.subr.bf16.mxu1 %v1926_v61 }
 0x226   : > { %1661 = vmatmul.mubr.bf16.vlgmr.msra.gmra.mxu1 %v2087_v9 }
 0x227   : > { %1664 = vmatprep.mubr.bf16.mxu1 %v2090_v10  ;;  %1697 = vmatpush3.bf16.msra.mxu1 %v1796_v60 }
 0x228   : > { %1698 = vmatprep.subr.bf16.mxu1 %v1926_v61 }
 0x22b   : > { %1699 = vmatpush3.bf16.msra.mxu1 %v1797_v62 }
 0x22c   : > { %1704 = vmatprep.subr.bf16.mxu1 %v1926_v61 }
 0x22e   : > { %1665 = vmatmul.mubr.bf16.gmra.mxu1 %v2095_v11 }
 0x22f   : > { %1668 = vmatprep.mubr.bf16.mxu1 %v2098_v12 }
 0x236   : > { %1669 = vmatmul.mubr.bf16.gmra.mxu1 %v2103_v13 }
 0x237   : > { %1672 = vmatprep.mubr.bf16.mxu1 %v2106_v14 }
 0x23e   : > { %1673 = vmatmul.mubr.bf16.gmra.mxu1 %v2111_v15 }
 0x23f   : > { %1700 = vmatprep.mubr.msk.bf16.mxu1 %vm1927_vm2, %v1926_v61 }
 0x2e6   : > { %v1662_v43 = vpop.f32.mrf.mxu1 }
 0x2e8   : > { %v859_v44 = vpop.f32.mrf.mxu1 }
 0x2ea   : > { %v1663_v45 = vpop.f32.mrf.mxu1 }
 0x2eb   : > { %v923_v48 = vpack.c.bf16 %v1663_v45, %v1662_v43 }
 0x2ec   : > { %v862_v46 = vpop.f32.mrf.mxu1 }
 0x2ed   : > { %v922_v47 = vpack.c.bf16 %v862_v46, %v859_v44 }
 0x2ee   : > { %v1666_v49 = vpop.f32.mrf.mxu1 }
 0x2ef   : > { %1680 = vmatprep.mubr.msk.bf16.mxu0 %vm647_vm0, %v922_v47 }
 0x2f0   : > { %v875_v9 = vpop.f32.mrf.mxu1  ;;  %1681 = vmatmul.mubr.msk.bf16.vlgmr.msra.gmra.mxu0 %vm647_vm0, %v923_v48 }
 0x2f2   : > { %v1667_v10 = vpop.f32.mrf.mxu1 }
 0x2f3   : > { %v925_v13 = vpack.c.bf16 %v1667_v10, %v1666_v49 }
 0x2f4   : > { %v878_v11 = vpop.f32.mrf.mxu1 }
 0x2f5   : > { %v924_v12 = vpack.c.bf16 %v878_v11, %v875_v9 }
 0x2f6   : > { %v1670_v50 = vpop.f32.mrf.mxu1 }
 0x2f7   : > { %1684 = vmatprep.mubr.msk.bf16.mxu0 %vm647_vm0, %v924_v12 }
 0x2f8   : > { %v891_v14 = vpop.f32.mrf.mxu1  ;;  %1685 = vmatmul.mubr.msk.bf16.gmra.mxu0 %vm647_vm0, %v925_v13 }
 0x2fa   : > { %v1671_v15 = vpop.f32.mrf.mxu1 }
 0x2fb   : > { %v927_v53 = vpack.c.bf16 %v1671_v15, %v1670_v50 }
 0x2fc   : > { %v894_v51 = vpop.f32.mrf.mxu1 }
 0x2fd   : > { %v926_v52 = vpack.c.bf16 %v894_v51, %v891_v14 }
 0x2fe   : > { %v1674_v54 = vpop.f32.mrf.mxu1 }
 0x2ff   : > { %1688 = vmatprep.mubr.msk.bf16.mxu0 %vm647_vm0, %v926_v52 }
 0x300   : > { %v907_v55 = vpop.f32.mrf.mxu1  ;;  %1689 = vmatmul.mubr.msk.bf16.gmra.mxu0 %vm647_vm0, %v927_v53 }
 0x302   : > { %v1675_v56 = vpop.f32.mrf.mxu1 }
 0x303   : > { %v929_v59 = vpack.c.bf16 %v1675_v56, %v1674_v54 }
 0x304   : > { %v910_v57 = vpop.f32.mrf.mxu1 }
 0x305   : > { %v928_v58 = vpack.c.bf16 %v910_v57, %v907_v55 }
 0x307   : > { %1692 = vmatprep.mubr.msk.bf16.mxu0 %vm647_vm0, %v928_v58 }
 0x308   : > { %1693 = vmatmul.mubr.msk.bf16.gmra.mxu0 %vm647_vm0, %v929_v59 }
 0x3b0   : > { %v1682_v63 = vpop.f32.mrf.mxu0 }
 0x3b1   : > { %1069 = vst.msk [vmem:[%s2184_s22 + $0x10] sm:$0xff] %vm647_vm0, %v1682_v63  ;;  %v1092_v2 = vsel %vm647_vm0, %v1682_v63, -inf }
 0x3b2   : > { %v1004_v0 = vpop.f32.mrf.mxu0 }
 0x3b3   : > { %1067 = vst.msk [vmem:[%s2184_s22] sm:$0xff] %vm647_vm0, %v1004_v0  ;;  %v1083_v6 = vsel %vm647_vm0, %v1004_v0, -inf }
 0x3b4   : > { %v1683_v1 = vpop.f32.mrf.mxu0 }
 0x3b5   : > { %1070 = vst.msk [vmem:[%s2184_s22 + $0x18] sm:$0xff] %vm647_vm0, %v1683_v1  ;;  %v1093_v3 = vsel %vm647_vm0, %v1683_v1, -inf }
 0x3b6   : > { %v1094_v4 = vmax.f32 %v1092_v2, %v1093_v3  ;;  %v1007_v5 = vpop.f32.mrf.mxu0 }
 0x3b7   : > { %1068 = vst.msk [vmem:[%s2184_s22 + $0x8] sm:$0xff] %vm647_vm0, %v1007_v5  ;;  %v1084_v7 = vsel %vm647_vm0, %v1007_v5, -inf }
 0x3b8   : > { %v1085_v8 = vmax.f32 %v1083_v6, %v1084_v7  ;;  %v1686_v16 = vpop.f32.mrf.mxu0  ;;  %v1095_v17 = vrot.slane %v1094_v4, 4 }
 0x3b9   : > { %1073 = vst.msk [vmem:[%s2184_s22 + $0x30] sm:$0xff] %vm647_vm0, %v1686_v16  ;;  %v1110_v22 = vsel %vm647_vm0, %v1686_v16, -inf }
 0x3ba   : > { %v1086_v18 = vrot.slane %v1085_v8, 4  ;;  %v1020_v19 = vpop.f32.mrf.mxu0  ;;  %v1096_v24 = vmax.f32 %v1094_v4, %v1095_v17 }
 0x3bb   : > { %1071 = vst.msk [vmem:[%s2184_s22 + $0x20] sm:$0xff] %vm647_vm0, %v1020_v19  ;;  %v1101_v27 = vsel %vm647_vm0, %v1020_v19, -inf }
 0x3bc   : > { %v1687_v20 = vpop.f32.mrf.mxu0  ;;  %v1087_v21 = vmax.f32 %v1085_v8, %v1086_v18  ;;  %v1097_v33 = vrot.slane %v1096_v24, 2 }
 0x3bd   : > { %1074 = vst.msk [vmem:[%s2184_s22 + $0x38] sm:$0xff] %vm647_vm0, %v1687_v20  ;;  %v1111_v23 = vsel %vm647_vm0, %v1687_v20, -inf }
 0x3be   : > { %v1112_v25 = vmax.f32 %v1110_v22, %v1111_v23  ;;  %v1023_v26 = vpop.f32.mrf.mxu0  ;;  %v1088_v32 = vrot.slane %v1087_v21, 2  ;;  %v1098_v41 = vmax.f32 %v1096_v24, %v1097_v33 }
 0x3bf   : > { %1072 = vst.msk [vmem:[%s2184_s22 + $0x28] sm:$0xff] %vm647_vm0, %v1023_v26  ;;  %v1102_v28 = vsel %vm647_vm0, %v1023_v26, -inf }
 0x3c0   : > { %v1113_v29 = vrot.slane %v1112_v25, 4  ;;  %v1103_v30 = vmax.f32 %v1101_v27, %v1102_v28  ;;  %v1690_v31 = vpop.f32.mrf.mxu0  ;;  %v1089_v39 = vmax.f32 %v1087_v21, %v1088_v32  ;;  %v1099_v13 = vrot.slane %v1098_v41, 1 }
 0x3c1   : > { %1077 = vst.msk [vmem:[%s2184_s22 + $0x50] sm:$0xff] %vm647_vm0, %v1690_v31  ;;  %v1128_v43 = vsel %vm647_vm0, %v1690_v31, -inf }
 0x3c2   : > { %v1104_v34 = vrot.slane %v1103_v30, 4  ;;  %v1036_v35 = vpop.f32.mrf.mxu0  ;;  %v1114_v36 = vmax.f32 %v1112_v25, %v1113_v29  ;;  %v1090_v11 = vrot.slane %v1089_v39, 1  ;;  %v1100_v59 = vmax.f32 %v1098_v41, %v1099_v13 }
 0x3c3   : > { %1075 = vst.msk [vmem:[%s2184_s22 + $0x40] sm:$0xff] %vm647_vm0, %v1036_v35  ;;  %v1119_v46 = vsel %vm647_vm0, %v1036_v35, -inf }
 0x3c4   : > { %v1105_v37 = vmax.f32 %v1103_v30, %v1104_v34  ;;  %v1691_v38 = vpop.f32.mrf.mxu0  ;;  %v1115_v45 = vrot.slane %v1114_v36, 2  ;;  %v1091_v55 = vmax.f32 %v1089_v39, %v1090_v11  ;;  %v1156_v20 = vpack.c.bf16 %v1100_v59, %v1100_v59 }
 0x3c5   : > { %1078 = vst.msk [vmem:[%s2184_s22 + $0x58] sm:$0xff] %vm647_vm0, %v1691_v38  ;;  %v1129_v40 = vsel %vm647_vm0, %v1691_v38, -inf }
 0x3c6   : > { %v1106_v42 = vrot.slane %v1105_v37, 2  ;;  %v1039_v44 = vpop.f32.mrf.mxu0  ;;  %v1130_v47 = vmax.f32 %v1128_v43, %v1129_v40  ;;  %v1116_v51 = vmax.f32 %v1114_v36, %v1115_v45  ;;  %v1155_v8 = vpack.c.bf16 %v1091_v55, %v1091_v55 }
 0x3c7   : > { %1076 = vst.msk [vmem:[%s2184_s22 + $0x48] sm:$0xff] %vm647_vm0, %v1039_v44  ;;  %v1120_v48 = vsel %vm647_vm0, %v1039_v44, -inf  ;;  %v1183_v31 = vunpack.c.l.b16 %v1156_v20 }
 0x3c8   : > { %v1107_v49 = vmax.f32 %v1105_v37, %v1106_v42  ;;  %v1121_v9 = vmax.f32 %v1119_v46, %v1120_v48  ;;  %v1694_v10 = vpop.f32.mrf.mxu0  ;;  %v1131_v12 = vrot.slane %v1130_v47, 4  ;;  %v1117_v1 = vrot.slane %v1116_v51, 1 }
 0x3c9   : > { %1081 = vst.msk [vmem:[%s2184_s22 + $0x70] sm:$0xff] %vm647_vm0, %v1694_v10  ;;  %v1146_v57 = vsel %vm647_vm0, %v1694_v10, -inf  ;;  %v1182_v26 = vunpack.c.l.b16 %v1155_v8 }
 0x3ca   : > { %v1108_v50 = vrot.slane %v1107_v49, 1  ;;  %v1122_v14 = vrot.slane %v1121_v9, 4  ;;  %v1052_v15 = vpop.f32.mrf.mxu0  ;;  %v1132_v52 = vmax.f32 %v1130_v47, %v1131_v12  ;;  %v1118_v21 = vmax.f32 %v1116_v51, %v1117_v1 }
 0x3cb   : > { %1079 = vst.msk [vmem:[%s2184_s22 + $0x60] sm:$0xff] %vm647_vm0, %v1052_v15  ;;  %v1137_v3 = vsel %vm647_vm0, %v1052_v15, -inf  ;;  %v1191_v36 = vsel %vm1190_vm3, %v1183_v31, %v1182_v26  ;;  %v1521_v15 = vld [vmem:[%s2297_s5] ss:$0 sm:$0xff] }
 0x3cc   : > { %v1123_v53 = vmax.f32 %v1121_v9, %v1122_v14  ;;  %v1695_v54 = vpop.f32.mrf.mxu0  ;;  %v1133_v56 = vrot.slane %v1132_v52, 2  ;;  %v1109_v60 = vmax.f32 %v1107_v49, %v1108_v50  ;;  %v1158_v32 = vpack.c.bf16 %v1118_v21, %v1118_v21  ;;  %v1798_v50 = vld [vmem:[#allocation5 + $0x8] sm:$0xff]   ;;  %v1799_v14 = vld [vmem:[#allocation5] sm:$0xff]  }
 0x3cd   : > { %1082 = vst.msk [vmem:[%s2184_s22 + $0x78] sm:$0xff] %vm647_vm0, %v1695_v54  ;;  %v1147_v58 = vsel %vm647_vm0, %v1695_v54, -inf }
 0x3ce   : > { %v1124_v62 = vrot.slane %v1123_v53, 2  ;;  %v1148_v63 = vmax.f32 %v1146_v57, %v1147_v58  ;;  %v1055_v0 = vpop.f32.mrf.mxu0  ;;  %v1134_v2 = vmax.f32 %v1132_v52, %v1133_v56  ;;  %v1157_v16 = vpack.c.bf16 %v1109_v60, %v1109_v60 }
 0x3cf   : > { %1080 = vst.msk [vmem:[%s2184_s22 + $0x68] sm:$0xff] %vm647_vm0, %v1055_v0  ;;  %v1138_v4 = vsel %vm647_vm0, %v1055_v0, -inf  ;;  %v1185_v41 = vunpack.c.l.b16 %v1158_v32  ;;  %s2250_s22 = scalar_lea.hbm %s2301_s9, %s1530_s28 }
 0x3d0   : > { %v1125_v5 = vmax.f32 %v1123_v53, %v1124_v62  ;;  %v1149_v6 = vrot.slane %v1148_v63, 4  ;;  %v1139_v7 = vmax.f32 %v1137_v3, %v1138_v4  ;;  %v1135_v22 = vrot.slane %v1134_v2, 1 }
 0x3d1   : > { %v1184_v27 = vunpack.c.l.b16 %v1157_v16 }
 0x3d2   : > { %v1126_v17 = vrot.slane %v1125_v5, 1  ;;  %v1150_v18 = vmax.f32 %v1148_v63, %v1149_v6  ;;  %v1140_v19 = vrot.slane %v1139_v7, 4  ;;  %v1136_v33 = vmax.f32 %v1134_v2, %v1135_v22 }
 0x3d3   : > { %v1193_v37 = vsel %vm1192_vm4, %v1184_v27, %v1191_v36 }
 0x3d4   : > { %v1127_v23 = vmax.f32 %v1125_v5, %v1126_v17  ;;  %v1151_v24 = vrot.slane %v1150_v18, 2  ;;  %v1141_v25 = vmax.f32 %v1139_v7, %v1140_v19  ;;  %v1160_v42 = vpack.c.bf16 %v1136_v33, %v1136_v33 }
 0x3d5   : > { %v1195_v44 = vsel %vm1194_vm5, %v1185_v41, %v1193_v37 }
 0x3d6   : > { %v1159_v28 = vpack.c.bf16 %v1127_v23, %v1127_v23  ;;  %v1152_v29 = vmax.f32 %v1150_v18, %v1151_v24  ;;  %v1142_v30 = vrot.slane %v1141_v25, 2  ;;  %v1187_v48 = vunpack.c.l.b16 %v1160_v42 }
 0x3d8   : > { %v1153_v34 = vrot.slane %v1152_v29, 1  ;;  %v1143_v35 = vmax.f32 %v1141_v25, %v1142_v30  ;;  %v1186_v38 = vunpack.c.l.b16 %v1159_v28 }
 0x3da   : > { %v1154_v39 = vmax.f32 %v1152_v29, %v1153_v34  ;;  %v1144_v40 = vrot.slane %v1143_v35, 1  ;;  %v1197_v46 = vsel %vm1196_vm6, %v1186_v38, %v1195_v44 }
 0x3db   : > { %v1199_v10 = vsel %vm1198_vm7, %v1187_v48, %v1197_v46 }
 0x3dc   : > { %v1145_v43 = vmax.f32 %v1143_v35, %v1144_v40  ;;  %v1162_v45 = vpack.c.bf16 %v1154_v39, %v1154_v39 }
 0x3de   : > { %v1161_v47 = vpack.c.bf16 %v1145_v43, %v1145_v43  ;;  %v1189_v9 = vunpack.c.l.b16 %v1162_v45 }
 0x3e0   : > { %v1188_v49 = vunpack.c.l.b16 %v1161_v47 }
 0x3e2   : > { %v1201_v11 = vsel %vm1200_vm8, %v1188_v49, %v1199_v10 }
 0x3e3   : > { %v1203_v12 = vsel %vm1202_vm9, %v1189_v9, %v1201_v11 }
 0x3e4   : > { %v1204_v13 = vpack.c.b16 %v1203_v12, %v1203_v12 }
 0x3e6   : > { %1701 = vmatmul.mubr.msk.bf16.vlgmr.msra.gmra.mxu1 %vm647_vm0, %v1204_v13 }
 0x3e7   : > { %1708 = vmatprep.mubr.msk.bf16.mxu1 %vm1927_vm2, %v1926_v61  ;;  %1705 = vmatpush3.bf16.msra.mxu1 %v1798_v50 }
 0x3e8   : > { %1706 = vmatprep.subr.bf16.mxu1 %v1926_v61  ;;  %v1525_v61 = vld [vmem:[%s2299_s7] ss:$0 sm:$0xff] }
 0x3eb   : > { %1707 = vmatpush3.bf16.msra.mxu1 %v1799_v14 }
 0x4a6   : > { %v1254_v51 = vpop.f32.mrf.mxu1 }
 0x4a7   : > { %v1255_v52 = vadd.f32 %v1521_v15, %v1254_v51 }
 0x4a8   : > { %v1702_v53 = vpop.f32.mrf.mxu1 }
 0x4a9   : > { %v1260_v54 = vmax.f32 %v1255_v52, 0.0 }
 0x4aa   : > { %v1257_v55 = vpop.f32.mrf.mxu1 }
 0x4ab   : > { %v1261_v56 = vpack.c.bf16 %v1260_v54, %v1260_v54 }
 0x4ac   : > { %v1703_v57 = vpop.f32.mrf.mxu1 }
 0x4ad   : > { %1709 = vmatmul.mubr.msk.bf16.vlgmr.msra.gmra.mxu1 %vm647_vm0, %v1261_v56 }
 0x56d   : > { %v1322_v58 = vpop.f32.mrf.mxu1 }
 0x56e   : > { %v1323_v59 = vadd.f32 %v1525_v61, %v1322_v58 }
 0x56f   : > { %v1710_v60 = vpop.f32.mrf.mxu1 }
 0x570   : > { %1328 = vst.msk [vmem:[%s379_s29] sm:$0xff] %vm647_vm0, %v1323_v59 }
 0x571   : > { %v1325_v62 = vpop.f32.mrf.mxu1 }
 0x572   : > { %1865 = shalt.err (!%p1862_p2)
}
 0x573   : > { %s1866_s27 = scalar_lea.hbm %s2250_s22, 128  ;;  %s1870_s29 = scalar_lea.hbm %s2301_s9, 256 }
 0x574   : > { %p1867_p4 = scmp.ne.s32.totalorder %s2250_s22, %s1866_s27  ;;  %p1871_p6 = scmp.lt.s32.totalorder %s2250_s22, %s2301_s9 }
 0x575   : > { %p1872_p9 = scmp.lt.s32.totalorder %s1870_s29, %s1866_s27 }
 0x576   : > { %p1868_p13 = pnand %p1867_p4, %p2017_p5 }
 0x577   : > { %p1873_p12 = por %p1872_p9, %p1871_p6 }
 0x578   : > { %p1869_p7 = pneg %p1868_p13 }
 0x57a   : > { %p1874_p10 = pnand %p1873_p12, %p1869_p7 }
 0x57c   : > { %1877 = shalt.err (!%p1874_p10)
}
 0x57d   : > { %1720 = dma.vmem_to_hbm [thread:$0]  (%p2017_p5), %s2252_s14, 128, %s2250_s22, %s1335_s23   ;;  %v1711_v63 = vpop.f32.mrf.mxu1 }
 0x57e PF: > { %p1737_p8 = scmp.ge.s32.totalorder %s1920_s12, 2  ;;  %s1372_s13 = sand.u32 1, %s1908_s30  }
 0x57f   : > { %p2311_p11 = scmp.ne.s32.totalorder %s2304_s20, 0  ;;  %s1373_s25 = scalar_lea.sflag [#allocation4], %s1372_s13 }
 0x581   : > { %p1730_p0 = pnand %p1737_p8, %p2311_p11 }
 0x583   : > { %p1731_p1 = pneg %p1730_p0 }
 0x585   : > { %1903 = dma.done.wait (%p1731_p1), %s1373_s25, 128  }
 0x586   : > { %1905 = vsyncadd (%p1731_p1), %s1373_s25, 4294967168  ;;  %p22_p3 = scmp.ge.s32.totalorder %s2004_s15, 4   ;;  %s2312_s30 = smov %s1912_s10 }
 0x587   : > { %s2313_s10 = smov %s1916_s11  ;;  %s2314_s11 = smov %s2015_s18 }
 0x588   : > { %s2315_s12 = smov %s2004_s15  ;;  %24 = sbr.rel (!%p22_p3) target bundleno = 5 (0x5), region = 111 }
 0x58d   :  { %1378 = vsyncpa [#allocation3], 1 }
 0x58e   :  { %1380 = vsyncpa [#allocation3 + $0x1], 1 }
 0x58f   :  { %1381 = vsyncpa [#allocation6], 1 }
 0x590   :  { %1382 = vsyncpa [#allocation4], 1 }
 0x591   :  { %1384 = vsyncpa [#allocation4 + $0x1], 1 }

</bundles_post_ra>
